<compile_context>
chip_gen: v7x
topology: tpu7x:2x2x1
jax: 0.10.0
libtpu: 0.0.40
codegen_flags: <defaults>
</compile_context>

<pallas_src>
import jax
import jax.numpy as jnp
from jax.experimental import pallas as pl
from jax.experimental.pallas import tpu as pltpu

B = 64        # batch   (fixed in module: self.B = 64)
NCLASS = 72   # classes (fixed in module: self.nclass = 72)
S = 30.0      # scale   (fixed in module: self.S = 30)


def amloss_kernel(cos_ref, phi_ref, tgt_ref, out_ref):
    cos = cos_ref[...]            # (B, NCLASS) f32, VMEM
    phi = phi_ref[...]            # (B, NCLASS) f32, VMEM
    tgt = tgt_ref[...]            # (B, 1) int32, VMEM

    b, c = cos.shape
    class_ids = jax.lax.broadcasted_iota(jnp.int32, (b, c), 1)
    onehot = class_ids == tgt     # (B, NCLASS) bool, one-hot of target

    # Chain 1: logsumexp over adjusted = S * where(onehot, cos, phi)
    sel = jnp.where(onehot, cos, phi)                       # single full-width select
    adjusted = S * sel                                       # (B, NCLASS)
    m = jnp.max(adjusted, axis=-1, keepdims=True)            # (B, 1)   XLU
    lse = m + jnp.log(jnp.sum(jnp.exp(adjusted - m), axis=-1, keepdims=True))  # EUP+XLU

    # Chain 2 (independent of chain 1): picked logit straight from cos.
    picked = S * jnp.sum(jnp.where(onehot, cos, 0.0), axis=-1, keepdims=True)  # (B, 1)

    loss_per_example = lse - picked                           # (B, 1)

    # Mean reduction -> scalar in SMEM (no lane-sparse vector store).
    out_ref[0] = jnp.sum(loss_per_example) * (1.0 / b)


def amloss(cos_theta, phi, target):
    """cos_theta, phi: (B, NCLASS) f32; target: (B,) int -> scalar f32."""
    tgt2d = target.astype(jnp.int32).reshape(B, 1)
    out = pl.pallas_call(
        amloss_kernel,
        out_shape=jax.ShapeDtypeStruct((1,), jnp.float32),
        in_specs=[
            pl.BlockSpec(memory_space=pltpu.MemorySpace.VMEM),
            pl.BlockSpec(memory_space=pltpu.MemorySpace.VMEM),
            pl.BlockSpec(memory_space=pltpu.MemorySpace.VMEM),
        ],
        out_specs=pl.BlockSpec(memory_space=pltpu.MemorySpace.SMEM),
    )(cos_theta, phi, tgt2d)
    return out[0]


def amloss_ref(cos_theta, phi, target):
    """Pure-JAX reference of the PyTorch forward, for sanity checking."""
    onehot = jax.nn.one_hot(target, NCLASS, dtype=jnp.bool_)
    adjusted = S * jnp.where(onehot, cos_theta, phi)
    logp = jax.nn.log_softmax(adjusted, axis=1)
    return -jnp.mean(jnp.take_along_axis(logp, target[:, None], axis=1))


if __name__ == "__main__":
    key = jax.random.PRNGKey(0)
    k1, k2, k3 = jax.random.split(key, 3)

    # Inputs consistent with the module's hardcoded B=64, nclass=72.
    cos_theta = jax.random.uniform(k1, (B, NCLASS), jnp.float32, -1.0, 1.0)
    # phi is typically cos_theta minus a margin in AM-softmax; any tensor works.
    phi = cos_theta - 0.35 + 0.01 * jax.random.normal(k2, (B, NCLASS), jnp.float32)
    target = jax.random.randint(k3, (B,), 0, NCLASS, jnp.int32)

    loss = amloss(cos_theta, phi, target)
    jax.block_until_ready(loss)

    ref = amloss_ref(cos_theta, phi, target)
    assert jnp.allclose(loss, ref, atol=1e-4, rtol=1e-4), (loss, ref)

    print("KERNEL_OK")
</pallas_src>

<mosaic_0001>
module attributes {stable_mosaic.version = 11 : i64} {
  func.func @amloss_kernel(%arg0: memref<64x72xf32, #tpu.memory_space<vmem>>, %arg1: memref<64x72xf32, #tpu.memory_space<vmem>>, %arg2: memref<64x1xi32, #tpu.memory_space<vmem>>, %arg3: memref<1xf32, #tpu.memory_space<smem>>) attributes {dimension_semantics = [], scalar_prefetch = 0 : i64, scratch_operands = 0 : i64, tpu.core_type = #tpu.core_type<tc>} {
    %c0 = arith.constant 0 : index
    %c0_0 = arith.constant 0 : index
    %0 = vector.load %arg0[%c0, %c0_0] : memref<64x72xf32, #tpu.memory_space<vmem>>, vector<64x72xf32>
    %c0_1 = arith.constant 0 : index
    %c0_2 = arith.constant 0 : index
    %1 = vector.load %arg1[%c0_1, %c0_2] : memref<64x72xf32, #tpu.memory_space<vmem>>, vector<64x72xf32>
    %c0_3 = arith.constant 0 : index
    %c0_4 = arith.constant 0 : index
    %2 = vector.load %arg2[%c0_3, %c0_4] : memref<64x1xi32, #tpu.memory_space<vmem>>, vector<64x1xi32>
    %3 = tpu.iota {dimensions = array<i32: 1>} : vector<64x72xi32>
    %4 = vector.broadcast %2 : vector<64x1xi32> to vector<64x72xi32>
    %5 = arith.cmpi eq, %3, %4 : vector<64x72xi32>
    %6 = arith.select %5, %0, %1 : vector<64x72xi1>, vector<64x72xf32>
    %cst = arith.constant 3.000000e+01 : f32
    %7 = vector.broadcast %cst : f32 to vector<64x72xf32>
    %8 = arith.mulf %7, %6 : vector<64x72xf32>
    %cst_5 = arith.constant dense<0xFF800000> : vector<64xf32>
    %9 = vector.multi_reduction <maximumf>, %8, %cst_5 [1] : vector<64x72xf32> to vector<64xf32>
    %10 = vector.shape_cast %9 : vector<64xf32> to vector<64x1xf32>
    %11 = vector.broadcast %10 : vector<64x1xf32> to vector<64x72xf32>
    %12 = arith.subf %8, %11 : vector<64x72xf32>
    %13 = math.exp %12 : vector<64x72xf32>
    %cst_6 = arith.constant dense<0.000000e+00> : vector<64xf32>
    %14 = vector.multi_reduction <add>, %13, %cst_6 [1] : vector<64x72xf32> to vector<64xf32>
    %15 = vector.shape_cast %14 : vector<64xf32> to vector<64x1xf32>
    %16 = math.log %15 : vector<64x1xf32>
    %17 = arith.addf %10, %16 : vector<64x1xf32>
    %cst_7 = arith.constant 0.000000e+00 : f32
    %18 = vector.broadcast %cst_7 : f32 to vector<64x72xf32>
    %19 = arith.select %5, %0, %18 : vector<64x72xi1>, vector<64x72xf32>
    %cst_8 = arith.constant dense<0.000000e+00> : vector<64xf32>
    %20 = vector.multi_reduction <add>, %19, %cst_8 [1] : vector<64x72xf32> to vector<64xf32>
    %21 = vector.shape_cast %20 : vector<64xf32> to vector<64x1xf32>
    %cst_9 = arith.constant 3.000000e+01 : f32
    %22 = vector.broadcast %cst_9 : f32 to vector<64x1xf32>
    %23 = arith.mulf %22, %21 : vector<64x1xf32>
    %24 = arith.subf %17, %23 : vector<64x1xf32>
    %25 = vector.shape_cast %24 : vector<64x1xf32> to vector<1x64x1xf32>
    %cst_10 = arith.constant dense<0.000000e+00> : vector<1xf32>
    %26 = vector.multi_reduction <add>, %25, %cst_10 [1, 2] : vector<1x64x1xf32> to vector<1xf32>
    %27 = vector.shape_cast %26 : vector<1xf32> to vector<1x1x1xf32>
    %28 = vector.extract %27[0, 0, 0] : f32 from vector<1x1x1xf32>
    %cst_11 = arith.constant 1.562500e-02 : f32
    %29 = arith.mulf %28, %cst_11 : f32
    %c0_12 = arith.constant 0 : index
    %30 = memref.load %arg3[%c0_12] : memref<1xf32, #tpu.memory_space<smem>>
    memref.store %29, %arg3[%c0_12] : memref<1xf32, #tpu.memory_space<smem>>
    return
  }
}

</mosaic_0001>

<bundles_post_ra>
// kernel: tpu_custom_call.1
= control target key start
LH: loop header
LB: loop body
LE: loop exit
PB: predicated region body
PF: predicated region fallthrough
CT: control target
= control target key end

     0   :  { %8 = vsyncpa [#allocation3], 0  ;;  %s566_s0 = inlined_call_operand.vmem [shape: f32[64,72], index: 0, kind: input, shape index: {}]   ;;  %s567_s1 = inlined_call_operand.hbm [shape: f32[64,72], index: 1, kind: input, shape index: {}]   ;;  %s568_s2 = inlined_call_operand.vmem [shape: s32[64,1], index: 2, kind: input, shape index: {}]   ;;  %s569_s3 = inlined_call_operand.hbm [shape: f32[1], index: 3, kind: output, shape index: {}]  }
   0x1   :  { %9 = vsyncpa [#allocation4], 0  ;;  %s367_s12 = smov [#allocation2]   ;;  %s331_s16 = scalar_lea.hbm %s567_s1, 1024 }
   0x2   :  { %s17_s13 = sshll.u32 %s367_s12, 4  ;;  %p332_p0 = scmp.ne.s32.totalorder %s567_s1, %s331_s16  ;;  %s18_s13 = int_to_ptr.vmem [resolvable:$true] %s17_s13 }
   0x3   :  { %p335_p1 = scmp.lt.u32.totalorder %s331_s16, %s567_s1 }
   0x5   :  { %p337_p2 = pnand %p335_p1, %p332_p0 }
   0x7   :  { %340 = shalt.err (!%p337_p2)
}
   0x8   :  { %s341_s21 = scalar_lea.vmem %s18_s13, 1024  ;;  %p346_p4 = scmp.lt.s32.totalorder %s18_s13, %s18_s13 }
   0x9   :  { %p342_p3 = scmp.ne.s32.totalorder %s18_s13, %s341_s21  ;;  %p347_p5 = scmp.lt.s32.totalorder %s341_s21, %s341_s21 }
   0xb   :  { %p348_p6 = por %p347_p5, %p346_p4 }
   0xd   :  { %p349_p7 = pnand %p348_p6, %p342_p3 }
   0xf   :  { %352 = shalt.err (!%p349_p7)
}
  0x10   :  { %s368_s22 = smov 128   ;;  %s369_s23 = smov 8  }
  0x11   :  { %23 = dma.hbm_to_vmem [thread:$0]  %s567_s1, 1024, %s18_s13, [#allocation3], %s368_s22, %s368_s22, %s369_s23  }
  0x12   :  { %363 = dma.done.wait [#allocation3], 1024  }
  0x13   :  { %364 = vsyncadd [#allocation3], 4294966272  ;;  %v370_v0 = vmov 0   ;;  %v47_v1 = vld [vmem:[%s568_s2 + $0x10] sm:$0xff]  ;;  %v45_v2 = vld [vmem:[%s568_s2] sm:$0xff]  ;;  %v53_v9 = vlaneseq  ;;  %vm103_vm2 = vcmask 588800  }
  0x14   :  { %298 = vset.pattern.permute.xlu1 %v370_v0  ;;  %297 = vset.pattern.permute.xlu0 %v370_v0  ;;  %v48_v3 = vld [vmem:[%s568_s2 + $0x18] sm:$0xff]  ;;  %v46_v4 = vld [vmem:[%s568_s2 + $0x8] sm:$0xff]  ;;  %v49_v6 = vld [vmem:[%s568_s2 + $0x20] sm:$0xff]  ;;  %vm248_vm9 = vcmask 7168   ;;  %s353_s1 = scalar_lea.hbm %s569_s3, 16 }
  0x15   :  { %62 = vperm.xlu1 %298, %v47_v1   ;;  %56 = vperm.xlu0 %297, %v45_v2   ;;  %v50_v5 = vld [vmem:[%s568_s2 + $0x28] sm:$0xff]  ;;  %v52_v7 = vld [vmem:[%s568_s2 + $0x38] sm:$0xff]  ;;  %v51_v8 = vld [vmem:[%s568_s2 + $0x30] sm:$0xff]  ;;  %v428_v10 = vand.u32 127, %v53_v9  ;;  %p354_p8 = scmp.ne.s32.totalorder %s569_s3, %s353_s1  ;;  %p357_p9 = scmp.lt.u32.totalorder %s353_s1, %s569_s3 }
  0x16   :  { %v29_v11 = vld [vmem:[%s566_s0] sm:$0xff]  ;;  %v31_v13 = vld [vmem:[%s566_s0 + $0x10] sm:$0xff]  ;;  %v30_v18 = vld [vmem:[%s566_s0 + $0x8] sm:$0xff] }
  0x17   :  { %v37_v12 = vld [vmem:[#allocation2] sm:$0xff]  ;;  %v39_v14 = vld [vmem:[#allocation2 + $0x10] sm:$0xff]  ;;  %v38_v23 = vld [vmem:[#allocation2 + $0x8] sm:$0xff]  ;;  %p359_p10 = pnand %p357_p9, %p354_p8 }
  0x18   :  { %v32_v25 = vld [vmem:[%s566_s0 + $0x18] sm:$0xff]  ;;  %v33_v31 = vld [vmem:[%s566_s0 + $0x20] sm:$0xff]  ;;  %v34_v38 = vld [vmem:[%s566_s0 + $0x28] sm:$0xff] }
  0x19   :  { %65 = vperm.xlu1 %298, %v48_v3   ;;  %59 = vperm.xlu0 %297, %v46_v4   ;;  %v40_v26 = vld [vmem:[#allocation2 + $0x18] sm:$0xff]  ;;  %v41_v37 = vld [vmem:[#allocation2 + $0x20] sm:$0xff]  ;;  %v42_v39 = vld [vmem:[#allocation2 + $0x28] sm:$0xff] }
  0x1a   :  { %v35_v45 = vld [vmem:[%s566_s0 + $0x30] sm:$0xff]  ;;  %v36_v51 = vld [vmem:[%s566_s0 + $0x38] sm:$0xff] }
  0x1b   :  { %v43_v50 = vld [vmem:[#allocation2 + $0x30] sm:$0xff]  ;;  %v44_v52 = vld [vmem:[#allocation2 + $0x38] sm:$0xff] }
  0x1d   :  { %71 = vperm.xlu1 %298, %v50_v5   ;;  %68 = vperm.xlu0 %297, %v49_v6  }
  0x21   :  { %77 = vperm.xlu1 %298, %v52_v7   ;;  %74 = vperm.xlu0 %297, %v51_v8  }
  0x94   :  { %v63_v15 = vpop.permute.xlu1 %62  ;;  %v57_v16 = vpop.permute.xlu0 %56 }
  0x95   :  { %vm81_vm0 = vcmp.eq.s32.totalorder %v428_v10, %v63_v15  ;;  %vm79_vm1 = vcmp.eq.s32.totalorder %v428_v10, %v57_v16 }
  0x96   :  { %v87_v17 = vsel %vm79_vm1, %v29_v11, %v37_v12  ;;  %v89_v19 = vsel %vm81_vm0, %v31_v13, %v39_v14  ;;  %v441_v20 = vsel %vm79_vm1, %v29_v11, 0.0  ;;  %v443_v21 = vsel %vm81_vm0, %v31_v13, 0.0 }
  0x97   :  { %v95_v22 = vmul.f32 30.0, %v87_v17  ;;  %v445_v24 = vmul.f32 30.0, %v89_v19 }
  0x98   :  { %v66_v27 = vpop.permute.xlu1 %65  ;;  %v60_v28 = vpop.permute.xlu0 %59 }
  0x99   :  { %vm82_vm3 = vcmp.eq.s32.totalorder %v428_v10, %v66_v27  ;;  %vm80_vm4 = vcmp.eq.s32.totalorder %v428_v10, %v60_v28  ;;  %v104_v29 = vsel %vm103_vm2, %v95_v22, -inf  ;;  %v110_v36 = vsel %vm103_vm2, %v445_v24, -inf }
  0x9a   :  { %105 = vmax.xlane.f32.xlu0 %v104_v29  ;;  %v88_v30 = vsel %vm80_vm4, %v30_v18, %v38_v23  ;;  %v90_v32 = vsel %vm82_vm3, %v32_v25, %v40_v26  ;;  %v456_v33 = vsel %vm80_vm4, %v30_v18, 0.0  ;;  %v458_v34 = vsel %vm82_vm3, %v32_v25, 0.0 }
  0x9b   :  { %v96_v35 = vmul.f32 30.0, %v88_v30  ;;  %v98_v42 = vmul.f32 30.0, %v90_v32 }
  0x9c   :  { %v72_v40 = vpop.permute.xlu1 %71  ;;  %v69_v41 = vpop.permute.xlu0 %68 }
  0x9d   :  { %vm84_vm5 = vcmp.eq.s32.totalorder %v428_v10, %v72_v40  ;;  %vm83_vm6 = vcmp.eq.s32.totalorder %v428_v10, %v69_v41  ;;  %v107_v43 = vsel %vm103_vm2, %v96_v35, -inf  ;;  %v113_v55 = vsel %vm103_vm2, %v98_v42, -inf }
  0x9e   :  { %108 = vmax.xlane.f32.xlu1 %v107_v43  ;;  %111 = vmax.xlane.f32.xlu0 %v110_v36  ;;  %v91_v44 = vsel %vm83_vm6, %v33_v31, %v41_v37  ;;  %v92_v46 = vsel %vm84_vm5, %v34_v38, %v42_v39  ;;  %v471_v47 = vsel %vm83_vm6, %v33_v31, 0.0  ;;  %v473_v48 = vsel %vm84_vm5, %v34_v38, 0.0 }
  0x9f   :  { %v99_v49 = vmul.f32 30.0, %v91_v44  ;;  %v100_v57 = vmul.f32 30.0, %v92_v46 }
  0xa0   :  { %v78_v53 = vpop.permute.xlu1 %77  ;;  %v75_v54 = vpop.permute.xlu0 %74 }
  0xa1   :  { %vm86_vm7 = vcmp.eq.s32.totalorder %v428_v10, %v78_v53  ;;  %vm85_vm8 = vcmp.eq.s32.totalorder %v428_v10, %v75_v54  ;;  %v116_v56 = vsel %vm103_vm2, %v99_v49, -inf  ;;  %v119_v0 = vsel %vm103_vm2, %v100_v57, -inf }
  0xa2   :  { %117 = vmax.xlane.f32.xlu1 %v116_v56  ;;  %114 = vmax.xlane.f32.xlu0 %v113_v55  ;;  %v93_v58 = vsel %vm85_vm8, %v35_v45, %v43_v50  ;;  %v94_v59 = vsel %vm86_vm7, %v36_v51, %v44_v52  ;;  %v482_v60 = vsel %vm85_vm8, %v35_v45, 0.0  ;;  %v484_v61 = vsel %vm86_vm7, %v36_v51, 0.0 }
  0xa3   :  { %v101_v62 = vmul.f32 30.0, %v93_v58  ;;  %v102_v1 = vmul.f32 30.0, %v94_v59  ;;  %v214_v50 = vsel %vm103_vm2, %v443_v21, 0.0  ;;  %v211_v51 = vsel %vm103_vm2, %v456_v33, 0.0 }
  0xa4   :  { %v220_v52 = vsel %vm103_vm2, %v471_v47, 0.0  ;;  %v217_v53 = vsel %vm103_vm2, %v458_v34, 0.0  ;;  %v223_v54 = vsel %vm103_vm2, %v473_v48, 0.0  ;;  %v229_v21 = vsel %vm103_vm2, %v484_v61, 0.0 }
  0xa5   :  { %v122_v63 = vsel %vm103_vm2, %v101_v62, -inf  ;;  %v125_v2 = vsel %vm103_vm2, %v102_v1, -inf }
  0xa6   :  { %123 = vmax.xlane.f32.xlu1 %v122_v63  ;;  %120 = vmax.xlane.f32.xlu0 %v119_v0 }
  0xaa   :  { %126 = vmax.xlane.f32.xlu0 %v125_v2 }
 0x127   :  { %v489_v3 = vpop.xlane.xlu0 %105 }
 0x128   :  { %v128_v4 = vsub.f32 %v95_v22, %v489_v3 }
 0x12a   :  { %v136_v5 = vmul.f32 1.442695, %v128_v4 }
 0x12b   :  { %v492_v6 = vpop.xlane.xlu1 %108  ;;  %v494_v7 = vpop.xlane.xlu0 %111 }
 0x12c   :  { %299 = vpow2.f32 %v136_v5  ;;  %v129_v8 = vsub.f32 %v96_v35, %v492_v6  ;;  %v130_v9 = vsub.f32 %v445_v24, %v494_v7 }
 0x12e   :  { %v138_v10 = vmul.f32 1.442695, %v129_v8  ;;  %v140_v11 = vmul.f32 1.442695, %v130_v9 }
 0x12f   :  { %v499_v12 = vpop.xlane.xlu1 %117  ;;  %v501_v13 = vpop.xlane.xlu0 %114 }
 0x130   :  { %301 = vpow2.f32 %v138_v10  ;;  %v132_v14 = vsub.f32 %v99_v49, %v499_v12  ;;  %v131_v15 = vsub.f32 %v98_v42, %v501_v13  ;;  %v208_v49 = vsel %vm103_vm2, %v441_v20, 0.0 }
 0x131   :  { %303 = vpow2.f32 %v140_v11  ;;  %v226_v20 = vsel %vm103_vm2, %v482_v60, 0.0 }
 0x132   :  { %v144_v16 = vmul.f32 1.442695, %v132_v14  ;;  %v142_v17 = vmul.f32 1.442695, %v131_v15 }
 0x133   :  { %v505_v18 = vpop.xlane.xlu1 %123  ;;  %v507_v19 = vpop.xlane.xlu0 %120 }
 0x134   :  { %305 = vpow2.f32 %v144_v16  ;;  %v134_v22 = vsub.f32 %v101_v62, %v505_v18  ;;  %v133_v23 = vsub.f32 %v100_v57, %v507_v19 }
 0x135   :  { %307 = vpow2.f32 %v142_v17 }
 0x136   :  { %v300_v24 = vpop.eup %299  ;;  %v148_v25 = vmul.f32 1.442695, %v134_v22  ;;  %v146_v26 = vmul.f32 1.442695, %v133_v23 }
 0x137   :  { %v511_v27 = vpop.xlane.xlu0 %126  ;;  %v152_v28 = vsel %vm103_vm2, %v300_v24, 0.0 }
 0x138   :  { %309 = vpow2.f32 %v148_v25  ;;  %v135_v29 = vsub.f32 %v102_v1, %v511_v27  ;;  %153 = vadd.xlane.f32.xlu1 %v152_v28 }
 0x139   :  { %311 = vpow2.f32 %v146_v26 }
 0x13a   :  { %v302_v30 = vpop.eup %301  ;;  %v150_v31 = vmul.f32 1.442695, %v135_v29 }
 0x13b   :  { %v304_v32 = vpop.eup %303  ;;  %v155_v35 = vsel %vm103_vm2, %v302_v30, 0.0 }
 0x13c   :  { %313 = vpow2.f32 %v150_v31  ;;  %156 = vadd.xlane.f32.xlu0 %v155_v35  ;;  %v158_v36 = vsel %vm103_vm2, %v304_v32, 0.0 }
 0x13d   :  { %159 = vadd.xlane.f32.xlu1 %v158_v36 }
 0x13e   :  { %v306_v37 = vpop.eup %305 }
 0x13f   :  { %v308_v38 = vpop.eup %307  ;;  %v164_v39 = vsel %vm103_vm2, %v306_v37, 0.0 }
 0x140   :  { %v161_v40 = vsel %vm103_vm2, %v308_v38, 0.0 }
 0x141   :  { %165 = vadd.xlane.f32.xlu1 %v164_v39  ;;  %162 = vadd.xlane.f32.xlu0 %v161_v40 }
 0x142   :  { %v310_v41 = vpop.eup %309 }
 0x143   :  { %v312_v42 = vpop.eup %311  ;;  %v170_v43 = vsel %vm103_vm2, %v310_v41, 0.0 }
 0x144   :  { %v167_v44 = vsel %vm103_vm2, %v312_v42, 0.0 }
 0x145   :  { %171 = vadd.xlane.f32.xlu1 %v170_v43  ;;  %168 = vadd.xlane.f32.xlu0 %v167_v44 }
 0x146   :  { %v314_v45 = vpop.eup %313 }
 0x147   :  { %v173_v46 = vsel %vm103_vm2, %v314_v45, 0.0 }
 0x149   :  { %209 = vadd.xlane.f32.xlu1 %v208_v49  ;;  %174 = vadd.xlane.f32.xlu0 %v173_v46 }
 0x14d   :  { %215 = vadd.xlane.f32.xlu1 %v214_v50  ;;  %212 = vadd.xlane.f32.xlu0 %v211_v51 }
 0x151   :  { %221 = vadd.xlane.f32.xlu1 %v220_v52  ;;  %218 = vadd.xlane.f32.xlu0 %v217_v53 }
 0x155   :  { %227 = vadd.xlane.f32.xlu1 %v226_v20  ;;  %224 = vadd.xlane.f32.xlu0 %v223_v54 }
 0x159   :  { %230 = vadd.xlane.f32.xlu0 %v229_v21 }
 0x1c5   :  { %v154_v33 = vpop.xlane.xlu1 %153 }
 0x1c6   :  { %315 = vlog2.f32 %v154_v33 }
 0x1c9   :  { %v157_v47 = vpop.xlane.xlu0 %156 }
 0x1ca   :  { %v160_v55 = vpop.xlane.xlu1 %159  ;;  %317 = vlog2.f32 %v157_v47 }
 0x1cb   :  { %319 = vlog2.f32 %v160_v55 }
 0x1ce   :  { %v166_v34 = vpop.xlane.xlu1 %165  ;;  %v163_v56 = vpop.xlane.xlu0 %162 }
 0x1cf   :  { %321 = vlog2.f32 %v166_v34 }
 0x1d0   :  { %323 = vlog2.f32 %v163_v56  ;;  %v316_v57 = vpop.eup %315 }
 0x1d1   :  { %v177_v60 = vmul.f32 0.6931472, %v316_v57 }
 0x1d2   :  { %v172_v58 = vpop.xlane.xlu1 %171  ;;  %v169_v59 = vpop.xlane.xlu0 %168 }
 0x1d3   :  { %325 = vlog2.f32 %v172_v58  ;;  %v192_v4 = vadd.f32 %v177_v60, %v489_v3 }
 0x1d4   :  { %v318_v48 = vpop.eup %317  ;;  %327 = vlog2.f32 %v169_v59 }
 0x1d5   :  { %v320_v62 = vpop.eup %319  ;;  %v179_v61 = vmul.f32 0.6931472, %v318_v48 }
 0x1d6   :  { %v210_v63 = vpop.xlane.xlu1 %209  ;;  %v175_v0 = vpop.xlane.xlu0 %174  ;;  %v181_v1 = vmul.f32 0.6931472, %v320_v62 }
 0x1d7   :  { %v232_v2 = vmul.f32 30.0, %v210_v63  ;;  %329 = vlog2.f32 %v175_v0  ;;  %v193_v11 = vadd.f32 %v179_v61, %v492_v6 }
 0x1d8   :  { %v194_v16 = vadd.f32 %v181_v1, %v494_v7 }
 0x1d9   :  { %v322_v5 = vpop.eup %321  ;;  %v240_v9 = vsub.f32 %v192_v4, %v232_v2 }
 0x1da   :  { %v324_v8 = vpop.eup %323  ;;  %v216_v10 = vpop.xlane.xlu1 %215  ;;  %v185_v15 = vmul.f32 0.6931472, %v322_v5 }
 0x1db   :  { %v213_v14 = vpop.xlane.xlu0 %212  ;;  %v234_v17 = vmul.f32 30.0, %v216_v10  ;;  %v183_v23 = vmul.f32 0.6931472, %v324_v8  ;;  %v249_v3 = vsel %vm248_vm9, %v240_v9, 0.0 }
 0x1dc   :  { %v233_v22 = vmul.f32 30.0, %v213_v14  ;;  %v196_v6 = vadd.f32 %v185_v15, %v499_v12 }
 0x1dd   :  { %v326_v24 = vpop.eup %325  ;;  %v242_v25 = vsub.f32 %v194_v16, %v234_v17  ;;  %v195_v7 = vadd.f32 %v183_v23, %v501_v13 }
 0x1de   :  { %v241_v26 = vsub.f32 %v193_v11, %v233_v22  ;;  %v328_v28 = vpop.eup %327  ;;  %v222_v29 = vpop.xlane.xlu1 %221  ;;  %v189_v36 = vmul.f32 0.6931472, %v326_v24 }
 0x1df   :  { %v219_v30 = vpop.xlane.xlu0 %218  ;;  %v187_v31 = vmul.f32 0.6931472, %v328_v28  ;;  %v236_v35 = vmul.f32 30.0, %v222_v29  ;;  %v252_v40 = vsel %vm248_vm9, %v242_v25, 0.0 }
 0x1e0   :  { %v250_v32 = vsel %vm248_vm9, %v241_v26, 0.0  ;;  %v235_v38 = vmul.f32 30.0, %v219_v30  ;;  %v198_v52 = vadd.f32 %v189_v36, %v505_v18 }
 0x1e1   :  { %v251_v37 = vadd.f32 %v250_v32, %v249_v3  ;;  %v330_v39 = vpop.eup %329  ;;  %v244_v41 = vsub.f32 %v196_v6, %v236_v35  ;;  %v197_v50 = vadd.f32 %v187_v31, %v507_v19 }
 0x1e2   :  { %v243_v43 = vsub.f32 %v195_v7, %v235_v38  ;;  %v228_v44 = vpop.xlane.xlu1 %227  ;;  %v191_v46 = vmul.f32 0.6931472, %v330_v39 }
 0x1e3   :  { %v253_v42 = vadd.f32 %v252_v40, %v251_v37  ;;  %v225_v45 = vpop.xlane.xlu0 %224  ;;  %v238_v49 = vmul.f32 30.0, %v228_v44  ;;  %v256_v20 = vsel %vm248_vm9, %v244_v41, 0.0 }
 0x1e4   :  { %v237_v51 = vmul.f32 30.0, %v225_v45  ;;  %v254_v12 = vsel %vm248_vm9, %v243_v43, 0.0  ;;  %v199_v47 = vadd.f32 %v191_v46, %v511_v27 }
 0x1e5   :  { %v255_v53 = vadd.f32 %v254_v12, %v253_v42  ;;  %v246_v54 = vsub.f32 %v198_v52, %v238_v49 }
 0x1e6   :  { %v245_v13 = vsub.f32 %v197_v50, %v237_v51 }
 0x1e7   :  { %v231_v21 = vpop.xlane.xlu0 %230  ;;  %v257_v34 = vadd.f32 %v256_v20, %v255_v53  ;;  %v260_v19 = vsel %vm248_vm9, %v246_v54, 0.0 }
 0x1e8   :  { %v258_v33 = vsel %vm248_vm9, %v245_v13, 0.0  ;;  %v239_v55 = vmul.f32 30.0, %v231_v21 }
 0x1e9   :  { %v259_v57 = vadd.f32 %v258_v33, %v257_v34 }
 0x1ea   :  { %v247_v56 = vsub.f32 %v199_v47, %v239_v55 }
 0x1eb   :  { %v261_v58 = vadd.f32 %v260_v19, %v259_v57 }
 0x1ec   :  { %v262_v59 = vsel %vm248_vm9, %v247_v56, 0.0 }
 0x1ed   :  { %v263_v18 = vadd.f32 %v262_v59, %v261_v58 }
 0x1ef   :  { %264 = vadd.xlane.f32.xlu1 %v263_v18 }
 0x27c   :  { %v265_v48 = vpop.xlane.xlu1 %264 }
 0x27d   :  { %v266_v60 = vrot.slane %v265_v48, 4 }
 0x27f   :  { %v267_v62 = vadd.f32 %v266_v60, %v265_v48 }
 0x281   :  { %v268_v61 = vrot.slane %v267_v62, 2 }
 0x283   :  { %v269_v63 = vadd.f32 %v268_v61, %v267_v62 }
 0x285   :  { %v270_v0 = vrot.slane %v269_v63, 1 }
 0x287   :  { %v271_v1 = vadd.f32 %v270_v0, %v269_v63 }
 0x289   :  { %290 = vpush %v271_v1 }
 0x2ba   :  { %s291_s0 = spop %290 }
 0x2bb   :  { %s273_s29 = smul.f32 0.015625, %s291_s0 }
 0x2bd   :  { %275 = sst [smem:[#allocation5]] %s273_s29 }
 0x2be   :  { %362 = shalt.err (!%p359_p10)
}
 0x2bf   :  { %s371_s9 = smov [#allocation5]  }
 0x2c0   :  { %283 = dma.smem_to_hbm %s371_s9, 16, %s569_s3, [#allocation4]  }
 0x2c1   :  { %365 = dma.done.wait [#allocation4], 16  }
 0x2c2   :  { %366 = vsyncadd [#allocation4], 4294967280 }
 0x2c3   :  { %287 = sfence }
 0x2c4   :  { %288 = vsyncpa [#allocation3], 1 }
 0x2c5   :  { %289 = vsyncpa [#allocation4], 1 }

</bundles_post_ra>
